<compile_context>
chip_gen: v6e
topology: v6e:2x2x1
jax: 0.10.0
libtpu: 0.0.40
codegen_flags: <defaults>
</compile_context>

<pallas_src>
import jax
import jax.numpy as jnp
from jax import lax
from jax.experimental import pallas as pl
from jax.experimental.pallas import tpu as pltpu


def film_kernel(xT_ref, cfT_ref, w_ref, b_ref, oT_ref):
    # condit_T[j, n] = sum_f W[j, f] * cf_T[f, n]
    # Canonical [M,K]x[K,N] MXU matmul: contracts the minor axis of the resident
    # weight with the major axis of the streamed cf tile -> no in-kernel relayout.
    condit = jnp.dot(w_ref[...], cfT_ref[...],
                     preferred_element_type=jnp.float32)          # [2D, TB], f32
    condit = condit + b_ref[...]                                  # [2D, 1] lane-broadcast (f32)

    d = xT_ref.shape[0]
    gamma = condit[:d, :]    # sublane slice at D (multiple of 8) -> free
    beta = condit[d:, :]
    # FiLM elementwise stays in f32 (v5e has no bf16 VPU path); cast once at store.
    oT_ref[...] = (gamma * xT_ref[...].astype(jnp.float32) + beta).astype(oT_ref.dtype)


def _pick_batch_tile(B, block_b):
    """Batch (lane-axis) tile size.

    Small batches get a single full-extent block (full-dim block shapes are legal).
    Larger batches get 128-aligned lane tiles with >=2 grid steps so the "parallel"
    batch axis can shard across v7x's two TensorCores and pipeline DMA/compute.
    """
    if B <= 256:
        return B
    tb = min(block_b, pl.cdiv(B, 2))
    return ((tb + 127) // 128) * 128


def linear_film_with_feature(x, cell_line_features, weight, bias,
                             *, block_b=512, matmul_dtype=jnp.bfloat16):
    """x: [B, D], cell_line_features: [B, F], weight: [2D, F], bias: [2D].

    matmul_dtype: dtype of the MXU operands (cf and weight). Default bf16
    (MXU-native on v5e/v6e/v7x, halves HBM traffic); pass None for exact f32.
    Accumulation and the FiLM elementwise math are always f32.
    """
    B, D = x.shape
    F = cell_line_features.shape[1]
    assert weight.shape == (2 * D, F)
    assert bias.shape == (2 * D,)

    # Layout plumbing: put batch on the lane axis. These transposes are wrapper-side
    # (outside the kernel); in a real model the caller can carry the transposed
    # layout end-to-end and they constant-fold / fuse away under jit.
    xT = x.T                                        # [D, B]
    cfT = cell_line_features.T                      # [F, B]
    w_in = weight if matmul_dtype is None else weight.astype(matmul_dtype)
    cfT_in = cfT if matmul_dtype is None else cfT.astype(matmul_dtype)
    b_col = bias.reshape(2 * D, 1).astype(jnp.float32)   # column, broadcast across lanes

    tb = _pick_batch_tile(B, block_b)
    grid = (pl.cdiv(B, tb),)

    itemsize = lambda a: a.size * a.dtype.itemsize
    cost = pl.CostEstimate(
        flops=2 * B * F * (2 * D) + 3 * B * D,
        transcendentals=0,
        bytes_accessed=int(itemsize(xT) + itemsize(cfT_in) + itemsize(w_in)
                           + itemsize(b_col) + B * D * x.dtype.itemsize),
    )

    outT = pl.pallas_call(
        film_kernel,
        out_shape=jax.ShapeDtypeStruct((D, B), x.dtype),
        grid_spec=pltpu.PrefetchScalarGridSpec(
            num_scalar_prefetch=0,
            grid=grid,
            in_specs=[
                pl.BlockSpec((D, tb), lambda i: (0, i)),       # x^T tile (batch on lanes)
                pl.BlockSpec((F, tb), lambda i: (0, i)),       # cf^T tile (streamed)
                pl.BlockSpec((2 * D, F), lambda i: (0, 0)),    # weight, grid-invariant/resident
                pl.BlockSpec((2 * D, 1), lambda i: (0, 0)),    # bias column, resident
            ],
            out_specs=pl.BlockSpec((D, tb), lambda i: (0, i)), # lane-dense output tile
        ),
        compiler_params=pltpu.CompilerParams(
            dimension_semantics=("parallel",),
            vmem_limit_bytes=48 * 1024 * 1024,     # fits v7x's 64 MiB VMEM with headroom
        ),
        cost_estimate=cost,
    )(xT, cfT_in, w_in, b_col)

    # The module returns [film_output, cell_line_features]
    return [outT.T, cell_line_features]


if __name__ == "__main__":
    # Small shapes consistent with the module.
    B = 8      # batch
    F = 32     # num_cell_line_features
    D = 32     # out_dim

    key = jax.random.PRNGKey(0)
    kx, kc, kw, kb = jax.random.split(key, 4)

    x = jax.random.normal(kx, (B, D), dtype=jnp.float32)
    cell_line_features = jax.random.normal(kc, (B, F), dtype=jnp.float32)

    # Deterministic parameter init mirroring nn.Linear(F, 2*D):
    #   U(-1/sqrt(F), 1/sqrt(F)) for weight and bias, then bias[:D] += 1.
    bound = 1.0 / jnp.sqrt(jnp.float32(F))
    weight = jax.random.uniform(kw, (2 * D, F), minval=-bound, maxval=bound,
                                dtype=jnp.float32)
    bias = jax.random.uniform(kb, (2 * D,), minval=-bound, maxval=bound,
                              dtype=jnp.float32)
    bias = bias.at[:D].add(1.0)

    # Pure-JAX reference (full-precision matmul).
    condit = jnp.dot(cell_line_features, weight.T,
                     precision=lax.Precision.HIGHEST) + bias
    ref = condit[:, :D] * x + condit[:, D:]

    # Exact f32 MXU path: tight check.
    out32, cf_out = linear_film_with_feature(x, cell_line_features, weight, bias,
                                             matmul_dtype=None)
    jax.block_until_ready(out32)
    jax.block_until_ready(cf_out)
    assert out32.shape == (B, D)
    assert jnp.allclose(out32, ref, atol=1e-5, rtol=1e-5), "f32 path mismatch vs reference"
    assert jnp.array_equal(cf_out, cell_line_features)

    # Default (bf16 MXU operands, f32 accumulation) path: sanity check at bf16 tolerance.
    out_bf, _ = linear_film_with_feature(x, cell_line_features, weight, bias)
    jax.block_until_ready(out_bf)
    assert jnp.allclose(out_bf, ref, atol=5e-2, rtol=5e-2), "bf16 path mismatch vs reference"

    print("KERNEL_OK")
</pallas_src>

<mosaic_0001>
module attributes {stable_mosaic.version = 11 : i64} {
  func.func @film_kernel(%arg0: i32, %arg1: memref<32x8xf32, #tpu.memory_space<vmem>>, %arg2: memref<32x8xf32, #tpu.memory_space<vmem>>, %arg3: memref<64x32xf32, #tpu.memory_space<vmem>>, %arg4: memref<64x1xf32, #tpu.memory_space<vmem>>, %arg5: memref<32x8xf32, #tpu.memory_space<vmem>>) attributes {dimension_semantics = [#tpu.dimension_semantics<parallel>], iteration_bounds = array<i64: 1>, scalar_prefetch = 0 : i64, scratch_operands = 0 : i64, tpu.core_type = #tpu.core_type<tc>, window_params = [{transform_indices = @transform_0, window_bounds = array<i64: 32, 8>}, {transform_indices = @transform_1, window_bounds = array<i64: 32, 8>}, {pipeline_mode = #tpu.pipeline_mode<synchronous>, transform_indices = @transform_2, window_bounds = array<i64: 64, 32>}, {pipeline_mode = #tpu.pipeline_mode<synchronous>, transform_indices = @transform_3, window_bounds = array<i64: 64, 1>}, {transform_indices = @transform_4, window_bounds = array<i64: 32, 8>}]} {
    %c0 = arith.constant 0 : index
    %c0_0 = arith.constant 0 : index
    %0 = vector.load %arg3[%c0, %c0_0] : memref<64x32xf32, #tpu.memory_space<vmem>>, vector<64x32xf32>
    %c0_1 = arith.constant 0 : index
    %c0_2 = arith.constant 0 : index
    %1 = vector.load %arg2[%c0_1, %c0_2] : memref<32x8xf32, #tpu.memory_space<vmem>>, vector<32x8xf32>
    %cst = arith.constant dense<0.000000e+00> : vector<64x8xf32>
    %2 = tpu.matmul %0, %1, %cst {dimension_numbers = #tpu.dot_dimension_numbers<[1], [0], [0], [1], [0, 0, 1, 1], [], []>} : vector<64x32xf32>, vector<32x8xf32>, vector<64x8xf32> -> vector<64x8xf32>
    %c0_3 = arith.constant 0 : index
    %c0_4 = arith.constant 0 : index
    %3 = vector.load %arg4[%c0_3, %c0_4] : memref<64x1xf32, #tpu.memory_space<vmem>>, vector<64x1xf32>
    %4 = vector.broadcast %3 : vector<64x1xf32> to vector<64x8xf32>
    %5 = arith.addf %2, %4 : vector<64x8xf32>
    %6 = vector.extract_strided_slice %5 {offsets = [0, 0], sizes = [32, 8], strides = [1, 1]} : vector<64x8xf32> to vector<32x8xf32>
    %7 = vector.extract_strided_slice %5 {offsets = [32, 0], sizes = [32, 8], strides = [1, 1]} : vector<64x8xf32> to vector<32x8xf32>
    %c0_5 = arith.constant 0 : index
    %c0_6 = arith.constant 0 : index
    %8 = vector.load %arg1[%c0_5, %c0_6] : memref<32x8xf32, #tpu.memory_space<vmem>>, vector<32x8xf32>
    %9 = arith.mulf %6, %8 : vector<32x8xf32>
    %10 = arith.addf %9, %7 : vector<32x8xf32>
    %c0_7 = arith.constant 0 : index
    %c0_8 = arith.constant 0 : index
    %11 = vector.load %arg5[%c0_7, %c0_8] : memref<32x8xf32, #tpu.memory_space<vmem>>, vector<32x8xf32>
    tpu.vector_store %arg5[%c0_7, %c0_8], %10 {strides = array<i32>} : memref<32x8xf32, #tpu.memory_space<vmem>>, vector<32x8xf32>,
    return
  }
  func.func @transform_0(%arg0: i32) -> (i32, i32) {
    %c0_i32 = arith.constant 0 : i32
    %c0_i32_0 = arith.constant 0 : i32
    return %c0_i32, %arg0 : i32, i32
  }
  func.func @transform_1(%arg0: i32) -> (i32, i32) {
    %c0_i32 = arith.constant 0 : i32
    %c0_i32_0 = arith.constant 0 : i32
    return %c0_i32, %arg0 : i32, i32
  }
  func.func @transform_2(%arg0: i32) -> (i32, i32) {
    %c0_i32 = arith.constant 0 : i32
    %c0_i32_0 = arith.constant 0 : i32
    %c0_i32_1 = arith.constant 0 : i32
    return %c0_i32, %c0_i32_0 : i32, i32
  }
  func.func @transform_3(%arg0: i32) -> (i32, i32) {
    %c0_i32 = arith.constant 0 : i32
    %c0_i32_0 = arith.constant 0 : i32
    %c0_i32_1 = arith.constant 0 : i32
    return %c0_i32, %c0_i32_0 : i32, i32
  }
  func.func @transform_4(%arg0: i32) -> (i32, i32) {
    %c0_i32 = arith.constant 0 : i32
    %c0_i32_0 = arith.constant 0 : i32
    return %c0_i32, %arg0 : i32, i32
  }
}

</mosaic_0001>

<bundles_post_ra>
// kernel: tpu_custom_call.1
= control target key start
LH: loop header
LB: loop body
LE: loop exit
PB: predicated region body
PF: predicated region fallthrough
CT: control target
= control target key end

     0   :  { %v279_v2 = vmov 0   ;;  %vm77_vm0 = vcmask 261120   ;;  %vm219_vm1 = vcmask 64512   ;;  %s401_s1 = inlined_call_operand.vmem [shape: f32[32,8], index: 1, kind: input, shape index: {}]   ;;  %s402_s2 = inlined_call_operand.vmem [shape: f32[64,32], index: 2, kind: input, shape index: {}]   ;;  %s403_s3 = inlined_call_operand.vmem [shape: f32[64,1], index: 3, kind: input, shape index: {}]   ;;  %s404_s0 = inlined_call_operand.vmem [shape: f32[32,8], index: 0, kind: input, shape index: {}]   ;;  %s405_s4 = inlined_call_operand.vmem [shape: f32[32,8], index: 4, kind: output, shape index: {}]  }
   0x1   :  { %v28_v0 = vld [vmem:[%s401_s1 + $0x18] sm:$0xff]  ;;  %v27_v1 = vld [vmem:[%s401_s1 + $0x10] sm:$0xff]  ;;  %278 = vset.pattern.permute.xlu1 %v279_v2  ;;  %277 = vset.pattern.permute.xlu0 %v279_v2  ;;  %v26_v3 = vld [vmem:[%s401_s1 + $0x8] sm:$0xff] }
   0x2   :  { %248 = vmatprep.subr.mxu0 %v28_v0  ;;  %268 = vmatprep.subr.mxu1 %v28_v0  ;;  %v25_v4 = vld [vmem:[%s401_s1] sm:$0xff]  ;;  %v18_v7 = vld [vmem:[%s402_s2 + $0x8] sm:$0xff]  ;;  %v19_v9 = vld [vmem:[%s402_s2 + $0x10] sm:$0xff] }
   0x3   :  { %249 = vmatpush3.msra.mxu0 %v28_v0  ;;  %272 = vmatpush3.msra.mxu1 %v28_v0  ;;  %v17_v5 = vld [vmem:[%s402_s2] sm:$0xff]  ;;  %v22_v8 = vld [vmem:[%s402_s2 + $0x28] sm:$0xff]  ;;  %v23_v10 = vld [vmem:[%s402_s2 + $0x30] sm:$0xff] }
   0x4   :  { %250 = vmatprep.subr.mxu0 %v27_v1  ;;  %269 = vmatprep.subr.mxu1 %v27_v1  ;;  %v21_v6 = vld [vmem:[%s402_s2 + $0x20] sm:$0xff]  ;;  %v31_v11 = vld [vmem:[%s403_s3 + $0x10] sm:$0xff]  ;;  %v20_v13 = vld [vmem:[%s402_s2 + $0x18] sm:$0xff] }
   0x5   :  { %251 = vmatpush3.msra.mxu0 %v27_v1  ;;  %273 = vmatpush3.msra.mxu1 %v27_v1  ;;  %v29_v12 = vld [vmem:[%s403_s3] sm:$0xff]  ;;  %v24_v14 = vld [vmem:[%s402_s2 + $0x38] sm:$0xff]  ;;  %v30_v16 = vld [vmem:[%s403_s3 + $0x8] sm:$0xff] }
   0x6   :  { %252 = vmatprep.subr.mxu0 %v26_v3  ;;  %270 = vmatprep.subr.mxu1 %v26_v3  ;;  %v32_v15 = vld [vmem:[%s403_s3 + $0x18] sm:$0xff]  ;;  %v34_v17 = vld [vmem:[%s403_s3 + $0x28] sm:$0xff]  ;;  %v33_v18 = vld [vmem:[%s403_s3 + $0x20] sm:$0xff] }
   0x7   :  { %253 = vmatpush3.msra.mxu0 %v26_v3  ;;  %274 = vmatpush3.msra.mxu1 %v26_v3  ;;  %v36_v19 = vld [vmem:[%s403_s3 + $0x38] sm:$0xff]  ;;  %v35_v20 = vld [vmem:[%s403_s3 + $0x30] sm:$0xff]  ;;  %v208_v27 = vld [vmem:[%s404_s0 + $0x8] sm:$0xff] }
   0x8   :  { %254 = vmatprep.subr.mxu0 %v25_v4  ;;  %271 = vmatprep.subr.mxu1 %v25_v4  ;;  %v207_v32 = vld [vmem:[%s404_s0] sm:$0xff]  ;;  %v210_v38 = vld [vmem:[%s404_s0 + $0x18] sm:$0xff]  ;;  %v209_v46 = vld [vmem:[%s404_s0 + $0x10] sm:$0xff] }
   0x9   :  { %255 = vmatpush3.msra.mxu0 %v25_v4  ;;  %275 = vmatpush3.msra.mxu1 %v25_v4 }
   0xa   :  { %256 = vmatprep.mubr.msk.f32.mxu0 %vm77_vm0, %v17_v5  ;;  %262 = vmatprep.mubr.msk.f32.mxu1 %vm77_vm0, %v21_v6 }
   0xb   :  { %257 = vmatmul.mubr.msk.f32.vlgmr.msra.gmra.mxu0 %vm77_vm0, %v18_v7  ;;  %263 = vmatmul.mubr.msk.f32.vlgmr.msra.gmra.mxu1 %vm77_vm0, %v22_v8 }
   0xc   :  { %259 = vmatprep.mubr.msk.f32.mxu0 %vm77_vm0, %v19_v9  ;;  %265 = vmatprep.mubr.msk.f32.mxu1 %vm77_vm0, %v23_v10 }
   0xd   :  { %49 = vperm.xlu1 %278, %v31_v11   ;;  %39 = vperm.xlu0 %277, %v29_v12  }
   0xf   :  { %260 = vmatmul.mubr.msk.f32.gmra.mxu0 %vm77_vm0, %v20_v13  ;;  %266 = vmatmul.mubr.msk.f32.gmra.mxu1 %vm77_vm0, %v24_v14 }
  0x11   :  { %54 = vperm.xlu1 %278, %v32_v15   ;;  %44 = vperm.xlu0 %277, %v30_v16  }
  0x15   :  { %64 = vperm.xlu1 %278, %v34_v17   ;;  %59 = vperm.xlu0 %277, %v33_v18  }
  0x19   :  { %74 = vperm.xlu1 %278, %v36_v19   ;;  %69 = vperm.xlu0 %277, %v35_v20  }
  0x88   :  { %v50_v21 = vpop.permute.xlu1 %49  ;;  %v40_v22 = vpop.permute.xlu0 %39 }
  0x8c   :  { %v55_v23 = vpop.permute.xlu1 %54  ;;  %v45_v24 = vpop.permute.xlu0 %44 }
  0x90   :  { %v65_v25 = vpop.permute.xlu1 %64  ;;  %v60_v29 = vpop.permute.xlu0 %59 }
  0x94   :  { %v75_v40 = vpop.permute.xlu1 %74  ;;  %v70_v52 = vpop.permute.xlu0 %69 }
  0xcb   :  { %v258_v26 = vpop.f32.mrf.mxu0  ;;  %v264_v28 = vpop.f32.mrf.mxu1 }
  0xcc   :  { %v174_v30 = vadd.f32 %v258_v26, %v45_v24  ;;  %v194_v35 = vadd.f32 %v264_v28, %v65_v25 }
  0xcd   :  { %v168_v31 = vpop.f32.mrf.mxu0  ;;  %v188_v33 = vpop.f32.mrf.mxu1 }
  0xce   :  { %v212_v34 = vmul.f32 %v208_v27, %v174_v30  ;;  %v169_v36 = vadd.f32 %v168_v31, %v40_v22  ;;  %v189_v43 = vadd.f32 %v188_v33, %v60_v29 }
  0xcf   :  { %v261_v37 = vpop.f32.mrf.mxu0  ;;  %v267_v39 = vpop.f32.mrf.mxu1 }
  0xd0   :  { %v216_v41 = vadd.f32 %v212_v34, %v194_v35  ;;  %v211_v42 = vmul.f32 %v207_v32, %v169_v36  ;;  %v184_v44 = vadd.f32 %v261_v37, %v55_v23  ;;  %v204_v50 = vadd.f32 %v267_v39, %v75_v40 }
  0xd1   :  { %v178_v45 = vpop.f32.mrf.mxu0  ;;  %v198_v47 = vpop.f32.mrf.mxu1 }
  0xd2   :  { %221 = vst.msk [vmem:[%s405_s4 + $0x8] sm:$0xff] %vm219_vm1, %v216_v41  ;;  %v215_v48 = vadd.f32 %v211_v42, %v189_v43  ;;  %v214_v49 = vmul.f32 %v210_v38, %v184_v44  ;;  %v179_v51 = vadd.f32 %v178_v45, %v50_v21  ;;  %v199_v55 = vadd.f32 %v198_v47, %v70_v52 }
  0xd4   :  { %220 = vst.msk [vmem:[%s405_s4] sm:$0xff] %vm219_vm1, %v215_v48  ;;  %v218_v53 = vadd.f32 %v214_v49, %v204_v50  ;;  %v213_v54 = vmul.f32 %v209_v46, %v179_v51 }
  0xd6   :  { %223 = vst.msk [vmem:[%s405_s4 + $0x18] sm:$0xff] %vm219_vm1, %v218_v53  ;;  %v217_v56 = vadd.f32 %v213_v54, %v199_v55 }
  0xd8   :  { %222 = vst.msk [vmem:[%s405_s4 + $0x10] sm:$0xff] %vm219_vm1, %v217_v56 }

</bundles_post_ra>
